<compile_context>
chip_gen: v5e
topology: v5e:2x2
jax: 0.10.0
libtpu: 0.0.40
codegen_flags: <defaults>
</compile_context>

<pallas_src>
import jax
import jax.numpy as jnp
from jax.experimental import pallas as pl
from jax.experimental.pallas import tpu as pltpu


# ---------------------------------------------------------------------------
# Kernel
# ---------------------------------------------------------------------------
def mlp_kernel(x_ref, w1_ref, b1_ref, w2_ref, b2_ref, o_ref, acc_ref):
    """One (batch-tile, hidden-tile) grid step of  relu(x@w1 + b1) @ w2 + b2.

    Grid axis 0 tiles the batch ("parallel"); grid axis 1 tiles the hidden
    dim ("arbitrary" — it is the reduction axis of fc2).  The f32 accumulator
    scratch is zeroed on the first hidden step and written out (plus the fc2
    bias) on the last.  With a single hidden step this degenerates to the
    fully fused path at negligible extra cost.
    """
    k = pl.program_id(1)

    @pl.when(k == 0)
    def _init():
        acc_ref[...] = jnp.zeros_like(acc_ref)

    # fc1 on the MXU; x is cast to the compute dtype in-register (the wrapper
    # never materializes a padded/casted HBM copy of the activations).
    x = x_ref[...].astype(w1_ref.dtype)
    h = jnp.dot(x, w1_ref[...], preferred_element_type=jnp.float32)
    # Epilogue (bias + ReLU) in f32 regardless of the MXU operand dtype.
    h = jnp.maximum(h + b1_ref[...], 0.0)
    # fc2 partial product for this hidden chunk, accumulated in f32.
    acc_ref[...] += jnp.dot(h.astype(w2_ref.dtype), w2_ref[...],
                            preferred_element_type=jnp.float32)

    @pl.when(k == pl.num_programs(1) - 1)
    def _finalize():
        o_ref[...] = (acc_ref[...] + b2_ref[...]).astype(o_ref.dtype)


# ---------------------------------------------------------------------------
# Tiling / VMEM planning
# ---------------------------------------------------------------------------
def _round_up(x, m):
    return ((x + m - 1) // m) * m


def _vmem_budget_bytes():
    """(capacity, ~80% budget).  Falls back to 64 MiB (v7x per-TC) if unknown."""
    cap = None
    try:
        info = pltpu.get_tpu_info()
        cap = getattr(info, "vmem_capacity_bytes", None)
    except Exception:
        cap = None
    if not cap:
        cap = 64 * 1024 * 1024
    return int(cap), int(cap * 0.80)


def _vmem_footprint(tb, th, d_in_p, d_out_p, x_isize, c_isize, o_isize):
    # Weight/bias blocks: count them double-buffered to stay safe even if the
    # compiler allocates two buffers for the constant-index_map inputs.
    weights = 2 * (d_in_p * th + th * d_out_p) * c_isize
    biases = 2 * (th + d_out_p) * 4
    # Streaming x / out tiles are double-buffered by the pipeline.
    stream = 2 * tb * d_in_p * x_isize + 2 * tb * d_out_p * o_isize
    # f32 accumulator scratch + the in-flight f32 hidden slab.
    scratch = tb * d_out_p * 4 + 2 * tb * th * 4
    return weights + biases + stream + scratch


def _choose_hidden_tile(d_in_p, h_p, d_out_p, c_isize, budget):
    """Largest hidden tile (multiple of 128) whose resident weights fit next
    to an MXU-sized (256-row) batch tile.  Planned with f32 x/out (worst case)."""
    th = h_p
    tb_plan = 256
    while th > 128 and _vmem_footprint(tb_plan, th, d_in_p, d_out_p,
                                       4, c_isize, 4) > budget:
        th = max(128, _round_up(th // 2, 128))
    return th


def _choose_batch_tile(batch, th, d_in_p, d_out_p, x_isize, c_isize, o_isize,
                       budget):
    # bf16 packs 16 rows per sublane group; keep batch tiles a multiple of 16.
    row_align = 16 if c_isize < 4 else 8
    mxu_m = 256                                   # MXU M target (v6e/v7x; fine on v5e)

    tb_cap = max(row_align, _round_up(batch, row_align))
    tb_floor = min(mxu_m, tb_cap)                 # never starve the MXU below this
    tb = min(512, tb_cap)                         # big tiles amortize ~0.35us/step

    # If VMEM is tight, trim toward the floor — never below it (the hidden dim
    # was already tiled in prepare_params to make the floor fit).
    while tb > tb_floor and _vmem_footprint(tb, th, d_in_p, d_out_p,
                                            x_isize, c_isize, o_isize) > budget:
        tb = max(tb_floor, _round_up(tb // 2, row_align))

    # Give v7x's two TensorCores at least two batch steps to shard when both
    # halves still fill the MXU (no-op on 1-TC v5e/v6e).
    if batch >= 2 * mxu_m and _round_up(batch, tb) // tb < 2:
        tb = max(tb_floor, _round_up(-(-batch // 2), row_align))

    return tb


# ---------------------------------------------------------------------------
# Parameter preparation (done once, hoisted out of the per-call path)
# ---------------------------------------------------------------------------
def prepare_params(w1, b1, w2, b2, *, compute_dtype=None):
    """Pad feature dims to 128 lanes, cast weights to the MXU operand dtype,
    and plan the hidden-dim tile for this TPU generation's VMEM."""
    D_in, H = w1.shape
    D_out = w2.shape[1]
    if compute_dtype is None:
        # bf16 MXU operands (f32 accumulate) beat multi-pass f32 on all of
        # v5e/v6e/v7x and halve the resident-weight VMEM footprint.
        compute_dtype = jnp.bfloat16 if w1.dtype == jnp.float32 else w1.dtype
    compute_dtype = jnp.dtype(compute_dtype)

    d_in_p = _round_up(D_in, 128)
    h_p = _round_up(H, 128)
    d_out_p = _round_up(D_out, 128)

    cap, budget = _vmem_budget_bytes()
    th = _choose_hidden_tile(d_in_p, h_p, d_out_p, compute_dtype.itemsize, budget)
    h_p = _round_up(h_p, th)      # hidden padding must be a multiple of its tile

    # Zero padding is exact: padded hidden cols give relu(0 + 0) = 0 and the
    # corresponding w2 rows are 0, so padded lanes contribute nothing.
    w1_p = jnp.pad(w1, ((0, d_in_p - D_in), (0, h_p - H))).astype(compute_dtype)
    b1_p = jnp.pad(jnp.reshape(b1, (1, -1)),
                   ((0, 0), (0, h_p - H))).astype(jnp.float32)
    w2_p = jnp.pad(w2, ((0, h_p - H), (0, d_out_p - D_out))).astype(compute_dtype)
    b2_p = jnp.pad(jnp.reshape(b2, (1, -1)),
                   ((0, 0), (0, d_out_p - D_out))).astype(jnp.float32)

    # TODO(synk): fp8 (v7x) / int8 (v6e) weight storage with per-channel scales
    # would halve resident-weight VMEM further; left as a follow-on.
    return dict(w1=w1_p, b1=b1_p, w2=w2_p, b2=b2_p,
                dims=(D_in, H, D_out), padded=(d_in_p, h_p, d_out_p),
                th=th, compute_dtype=compute_dtype,
                vmem_capacity=cap, vmem_budget=budget)


# ---------------------------------------------------------------------------
# Forward
# ---------------------------------------------------------------------------
def simple_nn_apply(x, params):
    """x: [B, D_in] -> [B, D_out], same semantics as the PyTorch module."""
    B, D_in = x.shape
    d_in, _, d_out = params["dims"]
    d_in_p, h_p, d_out_p = params["padded"]
    assert D_in == d_in, f"expected input dim {d_in}, got {D_in}"
    th = params["th"]
    compute_dtype = jnp.dtype(params["compute_dtype"])
    out_dtype = x.dtype

    x_isize = jnp.dtype(x.dtype).itemsize
    c_isize = compute_dtype.itemsize
    o_isize = jnp.dtype(out_dtype).itemsize
    cap, budget = params["vmem_capacity"], params["vmem_budget"]

    tb = _choose_batch_tile(B, th, d_in_p, d_out_p, x_isize, c_isize, o_isize,
                            budget)
    b_p = _round_up(B, tb)

    # Only materialize a padded copy of x when needed; the dtype cast happens
    # in-kernel, so already-aligned activations stream straight from HBM.
    if b_p != B or d_in_p != D_in:
        x_in = jnp.pad(x, ((0, b_p - B), (0, d_in_p - D_in)))
    else:
        x_in = x

    grid = (b_p // tb, h_p // th)

    footprint = _vmem_footprint(tb, th, d_in_p, d_out_p, x_isize, c_isize,
                                o_isize)
    vmem_limit = int(min(cap * 0.92,
                         max(footprint * 1.25, 16 * 1024 * 1024)))

    flops = 2 * b_p * (d_in_p * h_p + h_p * d_out_p)
    bytes_accessed = (x_in.size * x_isize
                      + params["w1"].size * c_isize
                      + params["w2"].size * c_isize
                      + params["b1"].size * 4 + params["b2"].size * 4
                      + b_p * d_out_p * o_isize)

    out_p = pl.pallas_call(
        mlp_kernel,
        out_shape=jax.ShapeDtypeStruct((b_p, d_out_p), out_dtype),
        grid=grid,
        in_specs=[
            # x: batch-tiled, revisited (not re-DMA'd) across the hidden axis.
            # TODO(synk): add pipeline_mode=pl.Buffered(3) here only if a
            # profile shows exposed DMA on this stream in the HBM-bound regime.
            pl.BlockSpec((tb, d_in_p), lambda i, k: (i, 0)),
            # Weights / biases: indexed only by the hidden axis; with a single
            # hidden step they stay VMEM-resident across all batch steps.
            pl.BlockSpec((d_in_p, th), lambda i, k: (0, k)),
            pl.BlockSpec((1, th), lambda i, k: (0, k)),
            pl.BlockSpec((th, d_out_p), lambda i, k: (k, 0)),
            pl.BlockSpec((1, d_out_p), lambda i, k: (0, 0)),
        ],
        out_specs=pl.BlockSpec((tb, d_out_p), lambda i, k: (i, 0)),
        scratch_shapes=[pltpu.VMEM((tb, d_out_p), jnp.float32)],
        compiler_params=pltpu.CompilerParams(
            dimension_semantics=("parallel", "arbitrary"),
            vmem_limit_bytes=vmem_limit,
        ),
        cost_estimate=pl.CostEstimate(
            flops=flops, transcendentals=0, bytes_accessed=bytes_accessed),
    )(x_in, params["w1"], params["b1"], params["w2"], params["b2"])

    if b_p != B or d_out_p != d_out:
        return out_p[:B, :d_out]
    return out_p


def simple_nn_forward(x, w1, b1, w2, b2, *, compute_dtype=None):
    """Convenience one-shot API (prefer prepare_params + simple_nn_apply so
    the weight pad/cast is not repeated every call)."""
    return simple_nn_apply(x, prepare_params(w1, b1, w2, b2,
                                             compute_dtype=compute_dtype))


def init_params(key, input_dim, hidden_dim, output_dim, dtype=jnp.float32):
    """Deterministic init mimicking nn.Linear's uniform(-1/sqrt(fan_in), +)."""
    k1, k2, k3, k4 = jax.random.split(key, 4)
    bound1 = 1.0 / (input_dim ** 0.5)
    bound2 = 1.0 / (hidden_dim ** 0.5)
    w1 = jax.random.uniform(k1, (input_dim, hidden_dim), dtype, -bound1, bound1)
    b1 = jax.random.uniform(k2, (1, hidden_dim), dtype, -bound1, bound1)
    w2 = jax.random.uniform(k3, (hidden_dim, output_dim), dtype, -bound2, bound2)
    b2 = jax.random.uniform(k4, (1, output_dim), dtype, -bound2, bound2)
    return w1, b1, w2, b2


if __name__ == "__main__":
    # NOTE: at these tiny shapes the kernel is pure launch/DMA overhead; plain
    # XLA fusion would win.  Shapes kept small for a fast deterministic check.
    B, input_dim, hidden_dim, output_dim = 8, 32, 64, 16

    key = jax.random.PRNGKey(0)
    kx, kp = jax.random.split(key)
    x = jax.random.normal(kx, (B, input_dim), jnp.float32)
    w1, b1, w2, b2 = init_params(kp, input_dim, hidden_dim, output_dim)

    # Reference in plain JAX (same semantics as the PyTorch module).
    ref = jnp.maximum(x @ w1 + b1, 0.0) @ w2 + b2

    # Default path: bf16 MXU operands / f32 accumulate, params prepared once.
    params_bf16 = prepare_params(w1, b1, w2, b2)
    out_bf16 = jax.block_until_ready(simple_nn_apply(x, params_bf16))
    assert out_bf16.shape == (B, output_dim)
    assert jnp.allclose(out_bf16, ref, atol=5e-2, rtol=5e-2)

    # Full-f32 MXU-operand path: must match the f32 reference tightly.
    params_f32 = prepare_params(w1, b1, w2, b2, compute_dtype=jnp.float32)
    out_f32 = jax.block_until_ready(simple_nn_apply(x, params_f32))
    assert out_f32.shape == (B, output_dim)
    assert jnp.allclose(out_f32, ref, atol=1e-5, rtol=1e-5)

    print("KERNEL_OK")
</pallas_src>

<mosaic_0001>
module attributes {stable_mosaic.version = 11 : i64} {
  func.func @mlp_kernel(%arg0: i32, %arg1: i32, %arg2: memref<16x128xf32, #tpu.memory_space<vmem>>, %arg3: memref<128x128xbf16, #tpu.memory_space<vmem>>, %arg4: memref<1x128xf32, #tpu.memory_space<vmem>>, %arg5: memref<128x128xbf16, #tpu.memory_space<vmem>>, %arg6: memref<1x128xf32, #tpu.memory_space<vmem>>, %arg7: memref<16x128xf32, #tpu.memory_space<vmem>>, %arg8: memref<16x128xf32, #tpu.memory_space<vmem>>) attributes {dimension_semantics = [#tpu.dimension_semantics<parallel>, #tpu.dimension_semantics<arbitrary>], iteration_bounds = array<i64: 1, 1>, scalar_prefetch = 0 : i64, scratch_operands = 1 : i64, tpu.core_type = #tpu.core_type<tc>, window_params = [{transform_indices = @transform_0, window_bounds = array<i64: 16, 128>}, {transform_indices = @transform_1, window_bounds = array<i64: 128, 128>}, {transform_indices = @transform_2, window_bounds = array<i64: 1, 128>}, {transform_indices = @transform_3, window_bounds = array<i64: 128, 128>}, {pipeline_mode = #tpu.pipeline_mode<synchronous>, transform_indices = @transform_4, window_bounds = array<i64: 1, 128>}, {transform_indices = @transform_5, window_bounds = array<i64: 16, 128>}]} {
    %c0_i32 = arith.constant 0 : i32
    %0 = arith.cmpi eq, %arg1, %c0_i32 : i32
    %1 = arith.extui %0 : i1 to i32
    %c0_i32_0 = arith.constant 0 : i32
    %2 = arith.cmpi ne, %1, %c0_i32_0 : i32
    scf.if %2 {
      %cst_16 = arith.constant 0.000000e+00 : f32
      %21 = vector.broadcast %cst_16 : f32 to vector<16x128xf32>
      %c0_17 = arith.constant 0 : index
      %c0_18 = arith.constant 0 : index
      %22 = vector.load %arg8[%c0_17, %c0_18] : memref<16x128xf32, #tpu.memory_space<vmem>>, vector<16x128xf32>
      tpu.vector_store %arg8[%c0_17, %c0_18], %21 {strides = array<i32>} : memref<16x128xf32, #tpu.memory_space<vmem>>, vector<16x128xf32>,
    } else {
    }
    %c0 = arith.constant 0 : index
    %c0_1 = arith.constant 0 : index
    %3 = vector.load %arg2[%c0, %c0_1] : memref<16x128xf32, #tpu.memory_space<vmem>>, vector<16x128xf32>
    %4 = arith.truncf %3 : vector<16x128xf32> to vector<16x128xbf16>
    %c0_2 = arith.constant 0 : index
    %c0_3 = arith.constant 0 : index
    %5 = vector.load %arg3[%c0_2, %c0_3] : memref<128x128xbf16, #tpu.memory_space<vmem>>, vector<128x128xbf16>
    %cst = arith.constant dense<0.000000e+00> : vector<16x128xf32>
    %6 = tpu.matmul %4, %5, %cst {dimension_numbers = #tpu.dot_dimension_numbers<[1], [0], [0], [1], [0, 0, 1, 1], [], []>} : vector<16x128xbf16>, vector<128x128xbf16>, vector<16x128xf32> -> vector<16x128xf32>
    %c0_4 = arith.constant 0 : index
    %c0_5 = arith.constant 0 : index
    %7 = vector.load %arg4[%c0_4, %c0_5] : memref<1x128xf32, #tpu.memory_space<vmem>>, vector<1x128xf32>
    %8 = vector.broadcast %7 : vector<1x128xf32> to vector<16x128xf32>
    %9 = arith.addf %6, %8 : vector<16x128xf32>
    %cst_6 = arith.constant 0.000000e+00 : f32
    %10 = vector.broadcast %cst_6 : f32 to vector<16x128xf32>
    %11 = arith.maximumf %9, %10 : vector<16x128xf32>
    %c0_7 = arith.constant 0 : index
    %c0_8 = arith.constant 0 : index
    %12 = vector.load %arg8[%c0_7, %c0_8] : memref<16x128xf32, #tpu.memory_space<vmem>>, vector<16x128xf32>
    %13 = arith.truncf %11 : vector<16x128xf32> to vector<16x128xbf16>
    %c0_9 = arith.constant 0 : index
    %c0_10 = arith.constant 0 : index
    %14 = vector.load %arg5[%c0_9, %c0_10] : memref<128x128xbf16, #tpu.memory_space<vmem>>, vector<128x128xbf16>
    %cst_11 = arith.constant dense<0.000000e+00> : vector<16x128xf32>
    %15 = tpu.matmul %13, %14, %cst_11 {dimension_numbers = #tpu.dot_dimension_numbers<[1], [0], [0], [1], [0, 0, 1, 1], [], []>} : vector<16x128xbf16>, vector<128x128xbf16>, vector<16x128xf32> -> vector<16x128xf32>
    %16 = arith.addf %12, %15 : vector<16x128xf32>
    %c0_12 = arith.constant 0 : index
    %c0_13 = arith.constant 0 : index
    %17 = vector.load %arg8[%c0_12, %c0_13] : memref<16x128xf32, #tpu.memory_space<vmem>>, vector<16x128xf32>
    tpu.vector_store %arg8[%c0_12, %c0_13], %16 {strides = array<i32>} : memref<16x128xf32, #tpu.memory_space<vmem>>, vector<16x128xf32>,
    %c0_i32_14 = arith.constant 0 : i32
    %18 = arith.cmpi eq, %arg1, %c0_i32_14 : i32
    %19 = arith.extui %18 : i1 to i32
    %c0_i32_15 = arith.constant 0 : i32
    %20 = arith.cmpi ne, %19, %c0_i32_15 : i32
    scf.if %20 {
      %c0_16 = arith.constant 0 : index
      %c0_17 = arith.constant 0 : index
      %21 = vector.load %arg8[%c0_16, %c0_17] : memref<16x128xf32, #tpu.memory_space<vmem>>, vector<16x128xf32>
      %c0_18 = arith.constant 0 : index
      %c0_19 = arith.constant 0 : index
      %22 = vector.load %arg6[%c0_18, %c0_19] : memref<1x128xf32, #tpu.memory_space<vmem>>, vector<1x128xf32>
      %23 = vector.broadcast %22 : vector<1x128xf32> to vector<16x128xf32>
      %24 = arith.addf %21, %23 : vector<16x128xf32>
      %c0_20 = arith.constant 0 : index
      %c0_21 = arith.constant 0 : index
      %25 = vector.load %arg7[%c0_20, %c0_21] : memref<16x128xf32, #tpu.memory_space<vmem>>, vector<16x128xf32>
      tpu.vector_store %arg7[%c0_20, %c0_21], %24 {strides = array<i32>} : memref<16x128xf32, #tpu.memory_space<vmem>>, vector<16x128xf32>,
    } else {
    }
    return
  }
  func.func @transform_0(%arg0: i32, %arg1: i32) -> (i32, i32) {
    %c0_i32 = arith.constant 0 : i32
    %c0_i32_0 = arith.constant 0 : i32
    return %arg0, %c0_i32 : i32, i32
  }
  func.func @transform_1(%arg0: i32, %arg1: i32) -> (i32, i32) {
    %c0_i32 = arith.constant 0 : i32
    %c0_i32_0 = arith.constant 0 : i32
    return %c0_i32, %arg1 : i32, i32
  }
  func.func @transform_2(%arg0: i32, %arg1: i32) -> (i32, i32) {
    %c0_i32 = arith.constant 0 : i32
    %c0_i32_0 = arith.constant 0 : i32
    return %c0_i32, %arg1 : i32, i32
  }
  func.func @transform_3(%arg0: i32, %arg1: i32) -> (i32, i32) {
    %c0_i32 = arith.constant 0 : i32
    %c0_i32_0 = arith.constant 0 : i32
    return %arg1, %c0_i32 : i32, i32
  }
  func.func @transform_4(%arg0: i32, %arg1: i32) -> (i32, i32) {
    %c0_i32 = arith.constant 0 : i32
    %c0_i32_0 = arith.constant 0 : i32
    %c0_i32_1 = arith.constant 0 : i32
    return %c0_i32, %c0_i32_0 : i32, i32
  }
  func.func @transform_5(%arg0: i32, %arg1: i32) -> (i32, i32) {
    %c0_i32 = arith.constant 0 : i32
    %c0_i32_0 = arith.constant 0 : i32
    return %arg0, %c0_i32 : i32, i32
  }
}

</mosaic_0001>

<bundles_post_ra>
// kernel: tpu_custom_call.1
= control target key start
LH: loop header
LB: loop body
LE: loop exit
PB: predicated region body
PF: predicated region fallthrough
CT: control target
= control target key end

     0   :  { %10 = vsyncpa [#allocation4], 0  ;;  %s533_s0 = inlined_call_operand.hbm [shape: f32[16,128], index: 0, kind: input, shape index: {}]   ;;  %s534_s1 = inlined_call_operand.hbm [shape: bf16[128,128], index: 1, kind: input, shape index: {}]   ;;  %s535_s2 = inlined_call_operand.vmem [shape: f32[1,128], index: 2, kind: input, shape index: {}]   ;;  %s536_s3 = inlined_call_operand.hbm [shape: bf16[128,128], index: 3, kind: input, shape index: {}]   ;;  %s537_s4 = inlined_call_operand.vmem [shape: f32[1,128], index: 4, kind: input, shape index: {}]   ;;  %s538_s5 = inlined_call_operand.hbm [shape: f32[16,128], index: 5, kind: output, shape index: {}]  }
   0x1   :  { %11 = vsyncpa [#allocation7], 0  ;;  %s30_s20 = sshll.u32 %s534_s1, 4  ;;  %s31_s20 = int_to_ptr.hbm [resolvable:$true] %s30_s20 }
   0x2   :  { %12 = vsyncpa [#allocation5], 0  ;;  %s471_s21 = smov [#allocation6]   ;;  %s17_s25 = sshll.u32 %s533_s0, 4  ;;  %s18_s25 = int_to_ptr.hbm [resolvable:$true] %s17_s25 }
   0x3   :  { %s32_s22 = sshll.u32 %s471_s21, 4  ;;  %s472_s26 = smov 64   ;;  %s33_s22 = int_to_ptr.vmem [resolvable:$true] %s32_s22 }
   0x4   :  { %s473_s27 = smov 4   ;;  %s474_s28 = smov [#allocation3]  }
   0x5   :  { %38 = dma.hbm_to_vmem [thread:$0]  %s31_s20, 1024, %s33_s22, [#allocation7], %s472_s26, %s472_s26, %s473_s27  }
   0x6   :  { %s19_s29 = sshll.u32 %s474_s28, 4  ;;  %s475_s30 = smov 128   ;;  %s20_s29 = int_to_ptr.vmem [resolvable:$true] %s19_s29 }
   0x7   :  { %s476_s6 = smov 8   ;;  %s45_s8 = sshll.u32 %s536_s3, 4  ;;  %s46_s8 = int_to_ptr.hbm [resolvable:$true] %s45_s8 }
   0x8   :  { %25 = dma.hbm_to_vmem [thread:$0]  %s18_s25, 256, %s20_s29, [#allocation4], %s475_s30, %s475_s30, %s476_s6  }
   0x9   :  { %s477_s9 = smov [#allocation8]  }
   0xa   :  { %s47_s0 = sshll.u32 %s477_s9, 4  ;;  %s48_s0 = int_to_ptr.vmem [resolvable:$true] %s47_s0 }
   0xb   :  { %53 = dma.hbm_to_vmem [thread:$0]  %s46_s8, 1024, %s48_s0, [#allocation7], %s472_s26, %s472_s26, %s473_s27  }
   0xc   :  { %465 = dma.done.wait [#allocation4], 256  }
   0xd   :  { %466 = vsyncadd [#allocation4], 4294967040 }
   0xe   :  { %467 = dma.done.wait [#allocation7], 2048  }
   0xf   :  { %468 = vsyncadd [#allocation7], 4294965248  ;;  %v350_v0 = vld [vmem:[#allocation6 + $0x38] sm:$0xff]  ;;  %v349_v1 = vld [vmem:[#allocation6 + $0x30] sm:$0xff]  ;;  %s478_s13 = smov [#allocation9]  }
  0x10   :  { %145 = vmatpush.bf16.msra.mxu0 %v350_v0  ;;  %v358_v2 = vld [vmem:[#allocation8 + $0x38] sm:$0xff]  ;;  %v357_v3 = vld [vmem:[#allocation8 + $0x30] sm:$0xff]  ;;  %v348_v4 = vld [vmem:[#allocation6 + $0x28] sm:$0xff]  ;;  %s263_s14 = sshll.u32 %s478_s13, 4  ;;  %s264_s14 = int_to_ptr.vmem [resolvable:$true] %s263_s14 }
  0x11   :  { %228 = vmatpush.bf16.msra.mxu1 %v358_v2  ;;  %v356_v5 = vld [vmem:[#allocation8 + $0x28] sm:$0xff]  ;;  %v347_v6 = vld [vmem:[#allocation6 + $0x20] sm:$0xff]  ;;  %v346_v8 = vld [vmem:[#allocation6 + $0x18] sm:$0xff] }
  0x12   :  { %v355_v7 = vld [vmem:[#allocation8 + $0x20] sm:$0xff]  ;;  %v345_v9 = vld [vmem:[#allocation6 + $0x10] sm:$0xff]  ;;  %v344_v10 = vld [vmem:[#allocation6 + $0x8] sm:$0xff] }
  0x13   :  { %v343_v11 = vld [vmem:[#allocation6] sm:$0xff]  ;;  %v74_v12 = vld [vmem:[#allocation3] sm:$0xff]  ;;  %v75_v13 = vld [vmem:[#allocation3 + $0x8] sm:$0xff] }
  0x14   :  { %146 = vmatpush.bf16.msra.mxu0 %v349_v1  ;;  %v76_v14 = vpack.c.bf16 %v75_v13, %v74_v12  ;;  %v354_v15 = vld [vmem:[#allocation8 + $0x18] sm:$0xff]  ;;  %v353_v16 = vld [vmem:[#allocation8 + $0x10] sm:$0xff]  ;;  %v352_v17 = vld [vmem:[#allocation8 + $0x8] sm:$0xff] }
  0x15   :  { %229 = vmatpush.bf16.msra.mxu1 %v357_v3  ;;  %v351_v18 = vld [vmem:[#allocation8] sm:$0xff]  ;;  %v367_v20 = vld [vmem:[%s535_s2] ss:$0 sm:$0xff]  ;;  %s265_s2 = sshll.u32 %s538_s5, 4  ;;  %s266_s2 = int_to_ptr.hbm [resolvable:$true] %s265_s2 }
  0x16   :  { %v368_v27 = vld [vmem:[%s537_s4] ss:$0 sm:$0xff] }
  0x18   :  { %147 = vmatpush.bf16.msra.mxu0 %v348_v4 }
  0x19   :  { %230 = vmatpush.bf16.msra.mxu1 %v356_v5 }
  0x1c   :  { %148 = vmatpush.bf16.msra.mxu0 %v347_v6 }
  0x1d   :  { %231 = vmatpush.bf16.msra.mxu1 %v355_v7 }
  0x20   :  { %149 = vmatpush.bf16.msra.mxu0 %v346_v8 }
  0x21   :  { %232 = vmatpush.bf16.msra.mxu1 %v354_v15 }
  0x24   :  { %150 = vmatpush.bf16.msra.mxu0 %v345_v9 }
  0x25   :  { %233 = vmatpush.bf16.msra.mxu1 %v353_v16 }
  0x28   :  { %151 = vmatpush.bf16.msra.mxu0 %v344_v10 }
  0x29   :  { %234 = vmatpush.bf16.msra.mxu1 %v352_v17 }
  0x2c   :  { %152 = vmatpush.bf16.msra.mxu0 %v343_v11 }
  0x2d   :  { %235 = vmatpush.bf16.msra.mxu1 %v351_v18 }
  0x2f   :  { %153 = vmatmul.bf16.vlgmr.msra.gmra.mxu0 %v76_v14 }
  0xac   :  { %v154_v19 = vpop.f32.mrf.mxu0 }
  0xad   :  { %v155_v21 = vadd.f32 %v367_v20, %v154_v19 }
  0xaf   :  { %v159_v24 = vmax.f32 %v155_v21, 0.0 }
  0xb4   :  { %v156_v22 = vpop.f32.mrf.mxu0 }
  0xb5   :  { %v157_v23 = vadd.f32 %v367_v20, %v156_v22 }
  0xb7   :  { %v160_v25 = vmax.f32 %v157_v23, 0.0 }
  0xb9   :  { %v163_v26 = vpack.c.bf16 %v160_v25, %v159_v24 }
  0xbb   :  { %236 = vmatmul.bf16.vlgmr.msra.gmra.mxu1 %v163_v26 }
 0x138   :  { %v237_v28 = vpop.f32.mrf.mxu1 }
 0x139   :  { %v255_v29 = vadd.f32 %v368_v27, %v237_v28 }
 0x13b   :  { %257 = vst [vmem:[#allocation9] sm:$0xff] %v255_v29 }
 0x140   :  { %v239_v30 = vpop.f32.mrf.mxu1 }
 0x141   :  { %v256_v31 = vadd.f32 %v368_v27, %v239_v30 }
 0x143   :  { %258 = vst [vmem:[#allocation9 + $0x8] sm:$0xff] %v256_v31 }
 0x144   :  { %271 = dma.vmem_to_hbm [thread:$0]  %s264_s14, 256, %s266_s2, [#allocation5], %s475_s30, %s475_s30, %s476_s6  }
 0x145   :  { %469 = dma.done.wait [#allocation5], 256  }
 0x146   :  { %470 = vsyncadd [#allocation5], 4294967040 }
 0x147   :  { %276 = vsyncpa [#allocation4], 1 }
 0x148   :  { %277 = vsyncpa [#allocation7], 1 }
 0x149   :  { %278 = vsyncpa [#allocation5], 1 }

</bundles_post_ra>
